<compile_context>
chip_gen: v7x
topology: tpu7x:2x2x1
jax: 0.10.0
libtpu: 0.0.40
codegen_flags: <defaults>
</compile_context>

<pallas_src>
import functools

import jax
import jax.numpy as jnp
from jax import lax
from jax.experimental import pallas as pl
from jax.experimental.pallas import tpu as pltpu


# ---------------------------------------------------------------------------
# Kernel 1: gather + reduce (used for max pooling; handles avg as fallback).
#   idx_ref: SMEM (n_groups * ks,) int32   (scalar prefetch)
#   x_ref  : VMEM (L+1, B_TILE, H_TILE)    batch on sublanes, hid on lanes
#   o_ref  : VMEM (n_groups, B_TILE, H_TILE)
# ---------------------------------------------------------------------------
def _gather_pool_kernel(idx_ref, x_ref, o_ref, *, ks, n_groups, method):
    def emit_group(g):
        # First gathered row seeds the accumulator (no -inf / zeros init op).
        acc = x_ref[idx_ref[g * ks]].astype(jnp.float32)      # (B_TILE, H_TILE)
        for j in range(1, ks):                                # ks: fully unrolled
            row = x_ref[idx_ref[g * ks + j]].astype(jnp.float32)
            if method == "avg":
                acc = acc + row
            else:
                acc = jnp.maximum(acc, row)
        if method == "avg":
            acc = acc * (1.0 / ks)
        # Dense (B_TILE, H_TILE) store -> unmasked vst (full vreg tiles).
        o_ref[g] = acc.astype(o_ref.dtype)

    if n_groups <= 64:
        # Small compile-time trip count: unroll so independent group gathers
        # can be overlapped by the scheduler.
        for g in range(n_groups):
            emit_group(g)
    else:
        def body(g, carry):
            emit_group(g)
            return carry
        lax.fori_loop(0, n_groups, body, 0)


# ---------------------------------------------------------------------------
# Kernel 2: average pooling as an MXU batched matmul.
#   p_ref: VMEM (n_groups, L+1) f32 pooling matrix (batch-invariant)
#   x_ref: VMEM (B_TILE, L+1, H_TILE)
#   o_ref: VMEM (B_TILE, n_groups, H_TILE)
# ---------------------------------------------------------------------------
def _avg_matmul_kernel(p_ref, x_ref, o_ref):
    b_tile = x_ref.shape[0]
    p = jnp.broadcast_to(p_ref[...][None], (b_tile,) + p_ref.shape)
    o_ref[...] = jnp.einsum(
        "bgl,blh->bgh",
        p,
        x_ref[...].astype(jnp.float32),
        preferred_element_type=jnp.float32,
    ).astype(o_ref.dtype)


def pooling_forward(x, index, ks, method="max", *, b_tile=8,
                    vmem_limit_bytes=32 * 1024 * 1024):
    """x: (batch, L, hid) float; index: (n, m) int; returns (batch, n, -1)."""
    batch, L, hid = x.shape
    n, m = index.shape
    assert (n * m) % ks == 0, "n*m must be divisible by ks (matches MaxPool1d)"
    n_groups = (n * m) // ks
    assert (n_groups * hid) % n == 0, "final view(batch, n, -1) must be exact"

    # hid tile on the lane axis (multiples of 128 keep stores unmasked).
    if hid % 512 == 0:
        h_tile = 512
    elif hid % 256 == 0:
        h_tile = 256
    elif hid % 128 == 0:
        h_tile = 128
    else:
        h_tile = hid
    num_h = hid // h_tile

    # batch tile on the sublane axis (multiple of 8 for f32).
    b_tile = max(8, (b_tile // 8) * 8)
    batch_pad = ((batch + b_tile - 1) // b_tile) * b_tile
    num_b = batch_pad // b_tile

    idx_flat = index.reshape(n * m).astype(jnp.int32)

    # Glue: append the zero row (torch.cat((x, zeros), 1)); pad batch with
    # zeros up to a sublane-tile multiple (padded rows are sliced off below).
    x_pad = jnp.concatenate([x, jnp.zeros((batch, 1, hid), x.dtype)], axis=1)
    if batch_pad != batch:
        x_pad = jnp.concatenate(
            [x_pad, jnp.zeros((batch_pad - batch, L + 1, hid), x.dtype)],
            axis=0)

    compiler_params = pltpu.CompilerParams(
        dimension_semantics=("parallel", "parallel"),
        vmem_limit_bytes=vmem_limit_bytes,
    )

    if method == "avg":
        # Average pooling is linear: fold gather + mean into a pooling matrix
        # P (n_groups, L+1) and run it on the MXU per batch tile.
        P = jnp.zeros((n_groups, L + 1), jnp.float32)
        P = P.at[jnp.arange(n_groups * ks) // ks, idx_flat].add(1.0 / ks)

        out = pl.pallas_call(
            _avg_matmul_kernel,
            out_shape=jax.ShapeDtypeStruct((batch_pad, n_groups, hid), x.dtype),
            grid=(num_b, num_h),
            in_specs=[
                pl.BlockSpec((n_groups, L + 1), lambda b, h: (0, 0)),
                pl.BlockSpec((b_tile, L + 1, h_tile), lambda b, h: (b, 0, h)),
            ],
            out_specs=pl.BlockSpec((b_tile, n_groups, h_tile),
                                   lambda b, h: (b, 0, h)),
            compiler_params=compiler_params,
        )(P, x_pad)
        out = out[:batch]                                   # (batch, n_groups, hid)
    else:
        # Max pooling: gather kernel, batch on the sublane axis.
        x_t = jnp.transpose(x_pad, (1, 0, 2))               # (L+1, batch_pad, hid)
        kernel = functools.partial(
            _gather_pool_kernel, ks=ks, n_groups=n_groups, method=method)
        out_t = pl.pallas_call(
            kernel,
            out_shape=jax.ShapeDtypeStruct((n_groups, batch_pad, hid), x.dtype),
            grid_spec=pltpu.PrefetchScalarGridSpec(
                num_scalar_prefetch=1,
                grid=(num_b, num_h),
                in_specs=[
                    pl.BlockSpec((L + 1, b_tile, h_tile),
                                 lambda b, h, idx: (0, b, h)),
                ],
                out_specs=pl.BlockSpec((n_groups, b_tile, h_tile),
                                       lambda b, h, idx: (0, b, h)),
            ),
            compiler_params=compiler_params,
        )(idx_flat, x_t)
        out = jnp.transpose(out_t, (1, 0, 2))[:batch]       # (batch, n_groups, hid)

    return out.reshape(batch, n, -1)


def pooling_ref(x, index, ks, method="max"):
    """Pure-JAX reference mirroring the PyTorch forward."""
    batch, L, hid = x.shape
    n, m = index.shape
    x_pad = jnp.concatenate([x, jnp.zeros((batch, 1, hid), x.dtype)], axis=1)
    g = x_pad[:, index.reshape(-1), :]                      # (batch, n*m, hid)
    g = g.reshape(batch, (n * m) // ks, ks, hid)
    r = g.mean(axis=2) if method == "avg" else g.max(axis=2)
    return r.reshape(batch, n, -1)


if __name__ == "__main__":
    key = jax.random.PRNGKey(0)
    ok = True

    configs = [
        # (batch, L, hid, n, ks)  with m == ks (typical usage)
        (2, 6, 128, 5, 3),
        (9, 10, 256, 4, 2),   # exercises batch padding + multi batch-tile grid
    ]

    for cfg_i, (batch, L, hid, n, ks) in enumerate(configs):
        m = ks
        key, kx, ki = jax.random.split(key, 3)
        x = jax.random.normal(kx, (batch, L, hid), dtype=jnp.float32)
        # index values in [0, L]; value L selects the appended zero row.
        index = jax.random.randint(ki, (n, m), 0, L + 1, dtype=jnp.int32)

        for method in ("max", "avg"):
            out = pooling_forward(x, index, ks, method=method)
            out = jax.block_until_ready(out)
            ref = pooling_ref(x, index, ks, method=method)
            if out.shape != (batch, n, hid):
                ok = False
            if not jnp.allclose(out, ref, atol=1e-5, rtol=1e-5):
                ok = False

    if ok:
        print("KERNEL_OK")
    else:
        print("KERNEL_MISMATCH")
</pallas_src>

<mosaic_0001>
module attributes {stable_mosaic.version = 11 : i64} {
  func.func @_gather_pool_kernel(%arg0: i32, %arg1: i32, %arg2: memref<15xi32, #tpu.memory_space<smem>>, %arg3: memref<7x8x128xf32, #tpu.memory_space<vmem>>, %arg4: memref<5x8x128xf32, #tpu.memory_space<vmem>>) attributes {dimension_semantics = [#tpu.dimension_semantics<parallel>, #tpu.dimension_semantics<parallel>], iteration_bounds = array<i64: 1, 1>, scalar_prefetch = 1 : i64, scratch_operands = 0 : i64, tpu.core_type = #tpu.core_type<tc>, window_params = [{transform_indices = @transform_0, window_bounds = array<i64: 7, 8, 128>}, {transform_indices = @transform_1, window_bounds = array<i64: 5, 8, 128>}]} {
    %c0 = arith.constant 0 : index
    %0 = memref.load %arg2[%c0] : memref<15xi32, #tpu.memory_space<smem>>
    %1 = arith.index_cast %0 : i32 to index
    %c0_0 = arith.constant 0 : index
    %c0_1 = arith.constant 0 : index
    %2 = vector.load %arg3[%1, %c0_0, %c0_1] : memref<7x8x128xf32, #tpu.memory_space<vmem>>, vector<1x8x128xf32>
    %3 = vector.shape_cast %2 : vector<1x8x128xf32> to vector<8x128xf32>
    %c1 = arith.constant 1 : index
    %4 = memref.load %arg2[%c1] : memref<15xi32, #tpu.memory_space<smem>>
    %5 = arith.index_cast %4 : i32 to index
    %c0_2 = arith.constant 0 : index
    %c0_3 = arith.constant 0 : index
    %6 = vector.load %arg3[%5, %c0_2, %c0_3] : memref<7x8x128xf32, #tpu.memory_space<vmem>>, vector<1x8x128xf32>
    %7 = vector.shape_cast %6 : vector<1x8x128xf32> to vector<8x128xf32>
    %8 = arith.maximumf %3, %7 : vector<8x128xf32>
    %c2 = arith.constant 2 : index
    %9 = memref.load %arg2[%c2] : memref<15xi32, #tpu.memory_space<smem>>
    %10 = arith.index_cast %9 : i32 to index
    %c0_4 = arith.constant 0 : index
    %c0_5 = arith.constant 0 : index
    %11 = vector.load %arg3[%10, %c0_4, %c0_5] : memref<7x8x128xf32, #tpu.memory_space<vmem>>, vector<1x8x128xf32>
    %12 = vector.shape_cast %11 : vector<1x8x128xf32> to vector<8x128xf32>
    %13 = arith.maximumf %8, %12 : vector<8x128xf32>
    %c0_6 = arith.constant 0 : index
    %c0_7 = arith.constant 0 : index
    %c0_8 = arith.constant 0 : index
    %14 = vector.load %arg4[%c0_6, %c0_7, %c0_8] : memref<5x8x128xf32, #tpu.memory_space<vmem>>, vector<1x8x128xf32>
    %15 = vector.shape_cast %14 : vector<1x8x128xf32> to vector<8x128xf32>
    %16 = vector.shape_cast %13 : vector<8x128xf32> to vector<1x8x128xf32>
    tpu.vector_store %arg4[%c0_6, %c0_7, %c0_8], %16 {strides = array<i32>} : memref<5x8x128xf32, #tpu.memory_space<vmem>>, vector<1x8x128xf32>,
    %c3 = arith.constant 3 : index
    %17 = memref.load %arg2[%c3] : memref<15xi32, #tpu.memory_space<smem>>
    %18 = arith.index_cast %17 : i32 to index
    %c0_9 = arith.constant 0 : index
    %c0_10 = arith.constant 0 : index
    %19 = vector.load %arg3[%18, %c0_9, %c0_10] : memref<7x8x128xf32, #tpu.memory_space<vmem>>, vector<1x8x128xf32>
    %20 = vector.shape_cast %19 : vector<1x8x128xf32> to vector<8x128xf32>
    %c4 = arith.constant 4 : index
    %21 = memref.load %arg2[%c4] : memref<15xi32, #tpu.memory_space<smem>>
    %22 = arith.index_cast %21 : i32 to index
    %c0_11 = arith.constant 0 : index
    %c0_12 = arith.constant 0 : index
    %23 = vector.load %arg3[%22, %c0_11, %c0_12] : memref<7x8x128xf32, #tpu.memory_space<vmem>>, vector<1x8x128xf32>
    %24 = vector.shape_cast %23 : vector<1x8x128xf32> to vector<8x128xf32>
    %25 = arith.maximumf %20, %24 : vector<8x128xf32>
    %c5 = arith.constant 5 : index
    %26 = memref.load %arg2[%c5] : memref<15xi32, #tpu.memory_space<smem>>
    %27 = arith.index_cast %26 : i32 to index
    %c0_13 = arith.constant 0 : index
    %c0_14 = arith.constant 0 : index
    %28 = vector.load %arg3[%27, %c0_13, %c0_14] : memref<7x8x128xf32, #tpu.memory_space<vmem>>, vector<1x8x128xf32>
    %29 = vector.shape_cast %28 : vector<1x8x128xf32> to vector<8x128xf32>
    %30 = arith.maximumf %25, %29 : vector<8x128xf32>
    %c1_15 = arith.constant 1 : index
    %c0_16 = arith.constant 0 : index
    %c0_17 = arith.constant 0 : index
    %31 = vector.load %arg4[%c1_15, %c0_16, %c0_17] : memref<5x8x128xf32, #tpu.memory_space<vmem>>, vector<1x8x128xf32>
    %32 = vector.shape_cast %31 : vector<1x8x128xf32> to vector<8x128xf32>
    %33 = vector.shape_cast %30 : vector<8x128xf32> to vector<1x8x128xf32>
    tpu.vector_store %arg4[%c1_15, %c0_16, %c0_17], %33 {strides = array<i32>} : memref<5x8x128xf32, #tpu.memory_space<vmem>>, vector<1x8x128xf32>,
    %c6 = arith.constant 6 : index
    %34 = memref.load %arg2[%c6] : memref<15xi32, #tpu.memory_space<smem>>
    %35 = arith.index_cast %34 : i32 to index
    %c0_18 = arith.constant 0 : index
    %c0_19 = arith.constant 0 : index
    %36 = vector.load %arg3[%35, %c0_18, %c0_19] : memref<7x8x128xf32, #tpu.memory_space<vmem>>, vector<1x8x128xf32>
    %37 = vector.shape_cast %36 : vector<1x8x128xf32> to vector<8x128xf32>
    %c7 = arith.constant 7 : index
    %38 = memref.load %arg2[%c7] : memref<15xi32, #tpu.memory_space<smem>>
    %39 = arith.index_cast %38 : i32 to index
    %c0_20 = arith.constant 0 : index
    %c0_21 = arith.constant 0 : index
    %40 = vector.load %arg3[%39, %c0_20, %c0_21] : memref<7x8x128xf32, #tpu.memory_space<vmem>>, vector<1x8x128xf32>
    %41 = vector.shape_cast %40 : vector<1x8x128xf32> to vector<8x128xf32>
    %42 = arith.maximumf %37, %41 : vector<8x128xf32>
    %c8 = arith.constant 8 : index
    %43 = memref.load %arg2[%c8] : memref<15xi32, #tpu.memory_space<smem>>
    %44 = arith.index_cast %43 : i32 to index
    %c0_22 = arith.constant 0 : index
    %c0_23 = arith.constant 0 : index
    %45 = vector.load %arg3[%44, %c0_22, %c0_23] : memref<7x8x128xf32, #tpu.memory_space<vmem>>, vector<1x8x128xf32>
    %46 = vector.shape_cast %45 : vector<1x8x128xf32> to vector<8x128xf32>
    %47 = arith.maximumf %42, %46 : vector<8x128xf32>
    %c2_24 = arith.constant 2 : index
    %c0_25 = arith.constant 0 : index
    %c0_26 = arith.constant 0 : index
    %48 = vector.load %arg4[%c2_24, %c0_25, %c0_26] : memref<5x8x128xf32, #tpu.memory_space<vmem>>, vector<1x8x128xf32>
    %49 = vector.shape_cast %48 : vector<1x8x128xf32> to vector<8x128xf32>
    %50 = vector.shape_cast %47 : vector<8x128xf32> to vector<1x8x128xf32>
    tpu.vector_store %arg4[%c2_24, %c0_25, %c0_26], %50 {strides = array<i32>} : memref<5x8x128xf32, #tpu.memory_space<vmem>>, vector<1x8x128xf32>,
    %c9 = arith.constant 9 : index
    %51 = memref.load %arg2[%c9] : memref<15xi32, #tpu.memory_space<smem>>
    %52 = arith.index_cast %51 : i32 to index
    %c0_27 = arith.constant 0 : index
    %c0_28 = arith.constant 0 : index
    %53 = vector.load %arg3[%52, %c0_27, %c0_28] : memref<7x8x128xf32, #tpu.memory_space<vmem>>, vector<1x8x128xf32>
    %54 = vector.shape_cast %53 : vector<1x8x128xf32> to vector<8x128xf32>
    %c10 = arith.constant 10 : index
    %55 = memref.load %arg2[%c10] : memref<15xi32, #tpu.memory_space<smem>>
    %56 = arith.index_cast %55 : i32 to index
    %c0_29 = arith.constant 0 : index
    %c0_30 = arith.constant 0 : index
    %57 = vector.load %arg3[%56, %c0_29, %c0_30] : memref<7x8x128xf32, #tpu.memory_space<vmem>>, vector<1x8x128xf32>
    %58 = vector.shape_cast %57 : vector<1x8x128xf32> to vector<8x128xf32>
    %59 = arith.maximumf %54, %58 : vector<8x128xf32>
    %c11 = arith.constant 11 : index
    %60 = memref.load %arg2[%c11] : memref<15xi32, #tpu.memory_space<smem>>
    %61 = arith.index_cast %60 : i32 to index
    %c0_31 = arith.constant 0 : index
    %c0_32 = arith.constant 0 : index
    %62 = vector.load %arg3[%61, %c0_31, %c0_32] : memref<7x8x128xf32, #tpu.memory_space<vmem>>, vector<1x8x128xf32>
    %63 = vector.shape_cast %62 : vector<1x8x128xf32> to vector<8x128xf32>
    %64 = arith.maximumf %59, %63 : vector<8x128xf32>
    %c3_33 = arith.constant 3 : index
    %c0_34 = arith.constant 0 : index
    %c0_35 = arith.constant 0 : index
    %65 = vector.load %arg4[%c3_33, %c0_34, %c0_35] : memref<5x8x128xf32, #tpu.memory_space<vmem>>, vector<1x8x128xf32>
    %66 = vector.shape_cast %65 : vector<1x8x128xf32> to vector<8x128xf32>
    %67 = vector.shape_cast %64 : vector<8x128xf32> to vector<1x8x128xf32>
    tpu.vector_store %arg4[%c3_33, %c0_34, %c0_35], %67 {strides = array<i32>} : memref<5x8x128xf32, #tpu.memory_space<vmem>>, vector<1x8x128xf32>,
    %c12 = arith.constant 12 : index
    %68 = memref.load %arg2[%c12] : memref<15xi32, #tpu.memory_space<smem>>
    %69 = arith.index_cast %68 : i32 to index
    %c0_36 = arith.constant 0 : index
    %c0_37 = arith.constant 0 : index
    %70 = vector.load %arg3[%69, %c0_36, %c0_37] : memref<7x8x128xf32, #tpu.memory_space<vmem>>, vector<1x8x128xf32>
    %71 = vector.shape_cast %70 : vector<1x8x128xf32> to vector<8x128xf32>
    %c13 = arith.constant 13 : index
    %72 = memref.load %arg2[%c13] : memref<15xi32, #tpu.memory_space<smem>>
    %73 = arith.index_cast %72 : i32 to index
    %c0_38 = arith.constant 0 : index
    %c0_39 = arith.constant 0 : index
    %74 = vector.load %arg3[%73, %c0_38, %c0_39] : memref<7x8x128xf32, #tpu.memory_space<vmem>>, vector<1x8x128xf32>
    %75 = vector.shape_cast %74 : vector<1x8x128xf32> to vector<8x128xf32>
    %76 = arith.maximumf %71, %75 : vector<8x128xf32>
    %c14 = arith.constant 14 : index
    %77 = memref.load %arg2[%c14] : memref<15xi32, #tpu.memory_space<smem>>
    %78 = arith.index_cast %77 : i32 to index
    %c0_40 = arith.constant 0 : index
    %c0_41 = arith.constant 0 : index
    %79 = vector.load %arg3[%78, %c0_40, %c0_41] : memref<7x8x128xf32, #tpu.memory_space<vmem>>, vector<1x8x128xf32>
    %80 = vector.shape_cast %79 : vector<1x8x128xf32> to vector<8x128xf32>
    %81 = arith.maximumf %76, %80 : vector<8x128xf32>
    %c4_42 = arith.constant 4 : index
    %c0_43 = arith.constant 0 : index
    %c0_44 = arith.constant 0 : index
    %82 = vector.load %arg4[%c4_42, %c0_43, %c0_44] : memref<5x8x128xf32, #tpu.memory_space<vmem>>, vector<1x8x128xf32>
    %83 = vector.shape_cast %82 : vector<1x8x128xf32> to vector<8x128xf32>
    %84 = vector.shape_cast %81 : vector<8x128xf32> to vector<1x8x128xf32>
    tpu.vector_store %arg4[%c4_42, %c0_43, %c0_44], %84 {strides = array<i32>} : memref<5x8x128xf32, #tpu.memory_space<vmem>>, vector<1x8x128xf32>,
    return
  }
  func.func @transform_0(%arg0: i32, %arg1: i32, %arg2: memref<15xi32, #tpu.memory_space<smem>>) -> (i32, i32, i32) {
    %c0_i32 = arith.constant 0 : i32
    %c0_i32_0 = arith.constant 0 : i32
    return %c0_i32, %arg0, %arg1 : i32, i32, i32
  }
  func.func @transform_1(%arg0: i32, %arg1: i32, %arg2: memref<15xi32, #tpu.memory_space<smem>>) -> (i32, i32, i32) {
    %c0_i32 = arith.constant 0 : i32
    %c0_i32_0 = arith.constant 0 : i32
    return %c0_i32, %arg0, %arg1 : i32, i32, i32
  }
}

</mosaic_0001>

<bundles_post_ra>
// kernel: tpu_custom_call.1
= control target key start
LH: loop header
LB: loop body
LE: loop exit
PB: predicated region body
PF: predicated region fallthrough
CT: control target
= control target key end

     0   :  { %s328_s0 = inlined_call_operand.hbm [shape: s32[15], index: 0, kind: input, shape index: {}]   ;;  %s329_s1 = inlined_call_operand.hbm [shape: f32[7,8,128], index: 1, kind: input, shape index: {}]   ;;  %s330_s2 = inlined_call_operand.hbm [shape: f32[5,8,128], index: 2, kind: output, shape index: {}]  }
   0x1   :  { %s188_s11 = scalar_lea.hbm %s328_s0, 16 }
   0x2   :  { %p189_p0 = scmp.ne.s32.totalorder %s328_s0, %s188_s11  ;;  %p192_p1 = scmp.lt.u32.totalorder %s188_s11, %s328_s0 }
   0x4   :  { %p194_p2 = pnand %p192_p1, %p189_p0 }
   0x6   :  { %197 = shalt.err (!%p194_p2)  }
   0x7   :  { %s248_s16 = smov [#allocation3]  }
   0x8   :  { %8 = dma.hbm_to_smem %s328_s0, 16, %s248_s16, [#allocation2] }
   0x9   :  { %242 = dma.done.wait [#allocation2], 16 }
   0xa   :  { %243 = vsyncadd [#allocation2], 4294967280 }
   0xb   :  { %10 = sfence }
   0xc   :  { %11 = vsyncpa [#allocation5], 0 }
   0xd   :  { %12 = vsyncpa [#allocation6], 0  ;;  %s249_s19 = smov [#allocation4]   ;;  %s198_s23 = scalar_lea.hbm %s329_s1, 896 }
   0xe   :  { %s18_s20 = sshll.u32 %s249_s19, 4  ;;  %p199_p3 = scmp.ne.s32.totalorder %s329_s1, %s198_s23  ;;  %s19_s20 = int_to_ptr.vmem [resolvable:$true] %s18_s20 }
   0xf   :  { %p202_p4 = scmp.lt.u32.totalorder %s198_s23, %s329_s1 }
  0x11   :  { %p204_p5 = pnand %p202_p4, %p199_p3 }
  0x13   :  { %207 = shalt.err (!%p204_p5)
}
  0x14   :  { %s208_s0 = scalar_lea.vmem %s19_s20, 896  ;;  %p213_p7 = scmp.lt.s32.totalorder %s19_s20, %s19_s20 }
  0x15   :  { %p209_p6 = scmp.ne.s32.totalorder %s19_s20, %s208_s0  ;;  %p214_p8 = scmp.lt.s32.totalorder %s208_s0, %s208_s0 }
  0x17   :  { %p215_p9 = por %p214_p8, %p213_p7 }
  0x19   :  { %p216_p10 = pnand %p215_p9, %p209_p6 }
  0x1b   :  { %219 = shalt.err (!%p216_p10)
}
  0x1c   :  { %s250_s28 = smov 128   ;;  %s251_s29 = smov 8  }
  0x1d   :  { %24 = dma.hbm_to_vmem [thread:$0]  %s329_s1, 896, %s19_s20, [#allocation5], %s250_s28, %s250_s28, %s251_s29  }
  0x1e   :  { %244 = dma.done.wait [#allocation5], 896  }
  0x1f   :  { %245 = vsyncadd [#allocation5], 4294966400  ;;  %s28_s4 = sld [smem:[#allocation3]]  ;;  %s155_s5 = sld [smem:[#allocation3 + $0x1]] }
  0x20   :  { %s157_s6 = sld [smem:[#allocation3 + $0x2]]  ;;  %s159_s7 = sld [smem:[#allocation3 + $0x3]] }
  0x21   :  { %s161_s8 = sld [smem:[#allocation3 + $0x4]]  ;;  %s163_s9 = sld [smem:[#allocation3 + $0x5]] }
  0x22   :  { %s295_s10 = sld [smem:[#allocation3 + $0x6]]  ;;  %s297_s11 = sld [smem:[#allocation3 + $0x7]] }
  0x23   :  { %s299_s12 = sld [smem:[#allocation3 + $0x8]]  ;;  %s301_s13 = sld [smem:[#allocation3 + $0x9]] }
  0x24   :  { %s303_s14 = sld [smem:[#allocation3 + $0xa]]  ;;  %s305_s15 = sld [smem:[#allocation3 + $0xb]] }
  0x25   :  { %s154_s1 = sshll.u32 %s28_s4, 3  ;;  %s156_s16 = sshll.u32 %s155_s5, 3 }
  0x26   :  { %s30_s17 = scalar_lea.vmem [#allocation4], %s154_s1  ;;  %s34_s18 = scalar_lea.vmem [#allocation4], %s156_s16 }
  0x27   :  { %v31_v0 = vld [vmem:[%s30_s17] sm:$0xff]  ;;  %s158_s19 = sshll.u32 %s157_s6, 3  ;;  %s160_s20 = sshll.u32 %s159_s7, 3 }
  0x28   :  { %v35_v1 = vld [vmem:[%s34_s18] sm:$0xff]  ;;  %s39_s21 = scalar_lea.vmem [#allocation4], %s158_s19  ;;  %s45_s22 = scalar_lea.vmem [#allocation4], %s160_s20 }
  0x29   :  { %v36_v2 = vmax.f32 %v31_v0, %v35_v1  ;;  %v40_v3 = vld [vmem:[%s39_s21] sm:$0xff]  ;;  %s162_s23 = sshll.u32 %s161_s8, 3  ;;  %s164_s24 = sshll.u32 %s163_s9, 3 }
  0x2a   :  { %v46_v4 = vld [vmem:[%s45_s22] sm:$0xff]  ;;  %s49_s25 = scalar_lea.vmem [#allocation4], %s162_s23  ;;  %s54_s26 = scalar_lea.vmem [#allocation4], %s164_s24 }
  0x2b   :  { %v41_v5 = vmax.f32 %v36_v2, %v40_v3  ;;  %v50_v6 = vld [vmem:[%s49_s25] sm:$0xff]  ;;  %s166_s27 = sshll.u32 %s295_s10, 3  ;;  %s168_s0 = sshll.u32 %s297_s11, 3 }
  0x2c   :  { %v55_v7 = vld [vmem:[%s54_s26] sm:$0xff]  ;;  %v51_v8 = vmax.f32 %v46_v4, %v50_v6  ;;  %s61_s30 = scalar_lea.vmem [#allocation4], %s166_s27  ;;  %s65_s3 = scalar_lea.vmem [#allocation4], %s168_s0 }
  0x2d   :  { %42 = vst [vmem:[#allocation7] sm:$0xff] %v41_v5  ;;  %v62_v9 = vld [vmem:[%s61_s30] sm:$0xff]  ;;  %s170_s4 = sshll.u32 %s299_s12, 3  ;;  %s172_s5 = sshll.u32 %s301_s13, 3 }
  0x2e   :  { %v66_v10 = vld [vmem:[%s65_s3] sm:$0xff]  ;;  %v56_v11 = vmax.f32 %v51_v8, %v55_v7  ;;  %s70_s6 = scalar_lea.vmem [#allocation4], %s170_s4  ;;  %s77_s7 = scalar_lea.vmem [#allocation4], %s172_s5 }
  0x2f   :  { %v67_v12 = vmax.f32 %v62_v9, %v66_v10  ;;  %v71_v13 = vld [vmem:[%s70_s6] sm:$0xff]  ;;  %s174_s8 = sshll.u32 %s303_s14, 3  ;;  %s176_s9 = sshll.u32 %s305_s15, 3 }
  0x30   :  { %v78_v14 = vld [vmem:[%s77_s7] sm:$0xff]  ;;  %58 = vst [vmem:[#allocation7 + $0x8] sm:$0xff] %v56_v11  ;;  %s81_s10 = scalar_lea.vmem [#allocation4], %s174_s8  ;;  %s86_s11 = scalar_lea.vmem [#allocation4], %s176_s9 }
  0x31   :  { %v72_v15 = vmax.f32 %v67_v12, %v71_v13  ;;  %v82_v16 = vld [vmem:[%s81_s10] sm:$0xff]  ;;  %s177_s1 = sld [smem:[#allocation3 + $0xc]]  ;;  %s179_s16 = sld [smem:[#allocation3 + $0xd]] }
  0x32   :  { %v87_v17 = vld [vmem:[%s86_s11] sm:$0xff]  ;;  %v83_v18 = vmax.f32 %v78_v14, %v82_v16  ;;  %s181_s12 = sld [smem:[#allocation3 + $0xe]]  ;;  %s252_s15 = smov [#allocation7]  }
  0x33   :  { %74 = vst [vmem:[#allocation7 + $0x10] sm:$0xff] %v72_v15  ;;  %s112_s20 = sshll.u32 %s252_s15, 4  ;;  %s113_s20 = int_to_ptr.vmem [resolvable:$true] %s112_s20 }
  0x34   :  { %v88_v19 = vmax.f32 %v83_v18, %v87_v17  ;;  %s220_s22 = scalar_lea.vmem %s113_s20, 640  ;;  %p225_p12 = scmp.lt.s32.totalorder %s113_s20, %s113_s20 }
  0x35   :  { %p221_p11 = scmp.ne.s32.totalorder %s113_s20, %s220_s22  ;;  %p226_p13 = scmp.lt.s32.totalorder %s220_s22, %s220_s22 }
  0x36   :  { %90 = vst [vmem:[#allocation7 + $0x18] sm:$0xff] %v88_v19 }
  0x37   :  { %s178_s13 = sshll.u32 %s177_s1, 3  ;;  %s180_s17 = sshll.u32 %s179_s16, 3 }
  0x38   :  { %s93_s18 = scalar_lea.vmem [#allocation4], %s178_s13  ;;  %s97_s19 = scalar_lea.vmem [#allocation4], %s180_s17 }
  0x39   :  { %v94_v20 = vld [vmem:[%s93_s18] sm:$0xff]  ;;  %s182_s14 = sshll.u32 %s181_s12, 3  ;;  %p227_p0 = por %p226_p13, %p225_p12 }
  0x3a   :  { %v98_v21 = vld [vmem:[%s97_s19] sm:$0xff]  ;;  %s102_s21 = scalar_lea.vmem [#allocation4], %s182_s14 }
  0x3b   :  { %v99_v22 = vmax.f32 %v94_v20, %v98_v21  ;;  %v103_v23 = vld [vmem:[%s102_s21] sm:$0xff]  ;;  %p228_p1 = pnand %p227_p0, %p221_p11 }
  0x3d   :  { %v104_v24 = vmax.f32 %v99_v22, %v103_v23 }
  0x3f   :  { %106 = vst [vmem:[#allocation7 + $0x20] sm:$0xff] %v104_v24 }
  0x40   :  { %231 = shalt.err (!%p228_p1)
}
  0x41   :  { %s232_s25 = scalar_lea.hbm %s330_s2, 640 }
  0x42   :  { %p233_p2 = scmp.ne.s32.totalorder %s330_s2, %s232_s25  ;;  %p236_p3 = scmp.lt.u32.totalorder %s232_s25, %s330_s2 }
  0x44   :  { %p238_p4 = pnand %p236_p3, %p233_p2 }
  0x46   :  { %241 = shalt.err (!%p238_p4)
}
  0x47   :  { %118 = dma.vmem_to_hbm [thread:$0]  %s113_s20, 640, %s330_s2, [#allocation6], %s250_s28, %s250_s28, %s251_s29  }
  0x48   :  { %246 = dma.done.wait [#allocation6], 640  }
  0x49   :  { %247 = vsyncadd [#allocation6], 4294966656 }
  0x4a   :  { %122 = vsyncpa [#allocation5], 1 }
  0x4b   :  { %123 = vsyncpa [#allocation6], 1 }

</bundles_post_ra>
